<compile_context>
chip_gen: v6e
topology: v6e:2x2x1
jax: 0.10.0
libtpu: 0.0.40
codegen_flags: <defaults>
</compile_context>

<pallas_src>
import functools

import jax
import jax.numpy as jnp
from jax.experimental import pallas as pl
from jax.experimental.pallas import tpu as pltpu

# Explicit scoped-VMEM budget: above the 32 MiB default, with headroom on v7x's 64 MiB.
_VMEM_LIMIT = 48 * 1024 * 1024

_PLANE_KEYS = ('xy', 'xz', 'yz')


def _ru(x, m):
    return (x + m - 1) // m * m


def _pick_tile(dim, candidates, unit):
    dp = _ru(max(dim, 1), unit)
    for c in candidates:
        if c <= dp and dp % c == 0:
            return c
    return unit


# ---------------------------------------------------------------------------
# Kernel 1: tiled matmul + bias (+ReLU).  bf16 operands on the MXU, f32 accum
# in a VMEM scratch, K-axis accumulation with init/finalize via pl.when.
# ---------------------------------------------------------------------------
def _matmul_kernel(x_ref, w_ref, b_ref, o_ref, acc_ref, *, relu):
    @pl.when(pl.program_id(2) == 0)
    def _():
        acc_ref[...] = jnp.zeros_like(acc_ref)

    acc_ref[...] += jnp.dot(x_ref[...], w_ref[...],
                            preferred_element_type=jnp.float32)

    @pl.when(pl.program_id(2) == pl.num_programs(2) - 1)
    def _():
        y = acc_ref[...] + b_ref[...]
        if relu:
            y = jnp.maximum(y, 0.0)
        o_ref[...] = y


def pallas_matmul(x, w, b=None, relu=False):
    """(M,K)@(K,N)+b with optional ReLU.  Tiled + pipelined, bf16 MXU / f32 accum."""
    M, K = x.shape
    N = w.shape[1]
    if b is None:
        b = jnp.zeros((N,), jnp.float32)
    tm = _pick_tile(M, (256, 128, 64, 32, 16), 16)     # 16: bf16 sublane packing
    tn = _pick_tile(N, (256, 128), 128)
    tk = _pick_tile(K, (512, 256, 128), 128)
    Mp, Np, Kp = _ru(M, tm), _ru(N, tn), _ru(K, tk)
    xp = jnp.pad(x.astype(jnp.bfloat16), ((0, Mp - M), (0, Kp - K)))
    wp = jnp.pad(w.astype(jnp.bfloat16), ((0, Kp - K), (0, Np - N)))
    bp = jnp.pad(b.astype(jnp.float32), (0, Np - N)).reshape(1, Np)
    out = pl.pallas_call(
        functools.partial(_matmul_kernel, relu=relu),
        grid=(Mp // tm, Np // tn, Kp // tk),
        in_specs=[
            pl.BlockSpec((tm, tk), lambda i, j, k: (i, k)),
            pl.BlockSpec((tk, tn), lambda i, j, k: (k, j)),
            pl.BlockSpec((1, tn), lambda i, j, k: (0, j)),
        ],
        out_specs=pl.BlockSpec((tm, tn), lambda i, j, k: (i, j)),
        out_shape=jax.ShapeDtypeStruct((Mp, Np), jnp.float32),
        scratch_shapes=[pltpu.VMEM((tm, tn), jnp.float32)],
        compiler_params=pltpu.CompilerParams(
            dimension_semantics=("parallel", "parallel", "arbitrary"),
            vmem_limit_bytes=_VMEM_LIMIT),
    )(xp, wp, bp)
    return out[:M, :N]


# ---------------------------------------------------------------------------
# Kernel 2: 3x3 / stride-1 / pad-1 conv (NHWC), one (plane x batch) image per
# grid step.  im2col is done only along W (3x, in JAX); the 3 row taps (dy) are
# accumulated inside the kernel on the VMEM-resident slab, so no 9x patches
# tensor ever hits HBM.  The kernel also emits per-image column sums /
# sum-of-squares of its output so the following BatchNorm statistics pass is
# fused into the conv epilogue.
# ---------------------------------------------------------------------------
def _conv3x3_kernel(x_ref, w_ref, b_ref, o_ref, s_ref, sq_ref, *, H, W, relu):
    hw = H * W
    xs = x_ref[0]                                        # ((H+2)*W, 3*Cin padded) f32
    acc = jnp.zeros((hw, o_ref.shape[-1]), jnp.float32)
    for dy in range(3):                                  # unrolled row taps -> MXU
        win = xs[dy * W:dy * W + hw, :].astype(jnp.bfloat16)
        acc = acc + jnp.dot(win, w_ref[dy], preferred_element_type=jnp.float32)
    acc = acc + b_ref[...]
    if relu:
        acc = jnp.maximum(acc, 0.0)
    o_ref[0] = acc
    s_ref[0] = jnp.sum(acc, axis=0, keepdims=True)
    sq_ref[0] = jnp.sum(acc * acc, axis=0, keepdims=True)


def pallas_conv3x3(x, w_oihw, bias, relu=False):
    """x: (B,H,W,Cx) with Cx >= Cin (extra lanes ignored).  Returns
    (y, colsum, colsumsq): y is (B,H,W,Coutp) lane-padded to 128; colsum/sumsq are
    per-image column sums of y (used to fuse BatchNorm statistics)."""
    Cout, Cin = w_oihw.shape[0], w_oihw.shape[1]
    x = x[..., :Cin].astype(jnp.float32)
    B, H, W, _ = x.shape
    C3, C3p, Coutp = 3 * Cin, _ru(3 * Cin, 128), _ru(Cout, 128)
    # 1x3 im2col along W only (3x the activation, not 9x), then dy halo rows.
    xp = jnp.pad(x, ((0, 0), (0, 0), (1, 1), (0, 0)))
    xw = jnp.concatenate([xp[:, :, d:d + W, :] for d in range(3)], axis=-1)
    xw = jnp.pad(xw, ((0, 0), (1, 1), (0, 0), (0, C3p - C3)))
    xw = xw.reshape(B, (H + 2) * W, C3p)
    wt = jnp.transpose(w_oihw, (2, 3, 1, 0)).reshape(3, C3, Cout)
    wt = jnp.pad(wt, ((0, 0), (0, C3p - C3), (0, Coutp - Cout))).astype(jnp.bfloat16)
    bp = jnp.pad(bias.astype(jnp.float32), (0, Coutp - Cout)).reshape(1, Coutp)

    y, s, sq = pl.pallas_call(
        functools.partial(_conv3x3_kernel, H=H, W=W, relu=relu),
        grid=(B,),
        in_specs=[
            pl.BlockSpec((1, (H + 2) * W, C3p), lambda i: (i, 0, 0)),
            pl.BlockSpec((3, C3p, Coutp), lambda i: (0, 0, 0)),
            pl.BlockSpec((1, Coutp), lambda i: (0, 0)),
        ],
        out_specs=[
            pl.BlockSpec((1, H * W, Coutp), lambda i: (i, 0, 0)),
            pl.BlockSpec((1, 1, Coutp), lambda i: (i, 0, 0)),
            pl.BlockSpec((1, 1, Coutp), lambda i: (i, 0, 0)),
        ],
        out_shape=[
            jax.ShapeDtypeStruct((B, H * W, Coutp), jnp.float32),
            jax.ShapeDtypeStruct((B, 1, Coutp), jnp.float32),
            jax.ShapeDtypeStruct((B, 1, Coutp), jnp.float32),
        ],
        compiler_params=pltpu.CompilerParams(
            dimension_semantics=("parallel",),
            vmem_limit_bytes=_VMEM_LIMIT),
    )(xw, wt, bp)
    return y.reshape(B, H, W, Coutp), s[:, 0, :], sq[:, 0, :]


# ---------------------------------------------------------------------------
# Kernels 3+4: training-mode BatchNorm with per-group batch statistics, tiled
# over rows: a reduction pass (resident (1,1,C) accumulators on the "arbitrary"
# row axis) plus an elementwise normalize(+ReLU) pass.
# ---------------------------------------------------------------------------
def _bn_stats_kernel(x_ref, s_ref, sq_ref):
    @pl.when(pl.program_id(1) == 0)
    def _():
        s_ref[...] = jnp.zeros_like(s_ref)
        sq_ref[...] = jnp.zeros_like(sq_ref)
    xv = x_ref[0]
    s_ref[0] += jnp.sum(xv, axis=0, keepdims=True)
    sq_ref[0] += jnp.sum(xv * xv, axis=0, keepdims=True)


def _bn_scale_kernel(x_ref, sc_ref, sh_ref, o_ref, *, relu):
    y = x_ref[0] * sc_ref[0] + sh_ref[0]
    if relu:
        y = jnp.maximum(y, 0.0)
    o_ref[0] = y


def pallas_bn_scale(x, scale, shift, relu=False):
    """x: (G, M, Cp) f32 with Cp % 128 == 0; y = x*scale + shift (+ReLU), row-tiled."""
    G, M, Cp = x.shape
    tm = _pick_tile(M, (512, 256, 128, 64, 32, 16, 8), 8)
    Mp = _ru(M, tm)
    xp = jnp.pad(x, ((0, 0), (0, Mp - M), (0, 0)))
    sc = scale.astype(jnp.float32).reshape(G, 1, Cp)
    sh = shift.astype(jnp.float32).reshape(G, 1, Cp)
    out = pl.pallas_call(
        functools.partial(_bn_scale_kernel, relu=relu),
        grid=(G, Mp // tm),
        in_specs=[
            pl.BlockSpec((1, tm, Cp), lambda g, i: (g, i, 0)),
            pl.BlockSpec((1, 1, Cp), lambda g, i: (g, 0, 0)),
            pl.BlockSpec((1, 1, Cp), lambda g, i: (g, 0, 0)),
        ],
        out_specs=pl.BlockSpec((1, tm, Cp), lambda g, i: (g, i, 0)),
        out_shape=jax.ShapeDtypeStruct((G, Mp, Cp), jnp.float32),
        compiler_params=pltpu.CompilerParams(
            dimension_semantics=("parallel", "parallel"),
            vmem_limit_bytes=_VMEM_LIMIT),
    )(xp, sc, sh)
    return out[:, :M, :]


def _bn_scale_shift(sum_c, sumsq_c, m_rows, gamma, beta, cp, eps=1e-5):
    """Fold training-mode batch stats into per-channel scale/shift (padded to cp)."""
    mean = sum_c / m_rows
    var = jnp.maximum(sumsq_c / m_rows - mean * mean, 0.0)
    gp = jnp.pad(gamma.astype(jnp.float32), (0, cp - gamma.shape[0]))
    bp = jnp.pad(beta.astype(jnp.float32), (0, cp - beta.shape[0]))
    scale = gp * jax.lax.rsqrt(var + eps)
    shift = bp - mean * scale
    return scale, shift


def pallas_batchnorm_grouped(x, gamma, beta, relu=False, eps=1e-5):
    """BatchNorm1d (training stats) with independent statistics per leading group.
    x: (G, M, C).  Tiled Pallas reduction + tiled normalize."""
    G, M, C = x.shape
    Cp = _ru(C, 128)
    xp = jnp.pad(x.astype(jnp.float32), ((0, 0), (0, 0), (0, Cp - C)))
    tm = _pick_tile(M, (512, 256, 128, 64, 32, 16, 8), 8)
    Mp = _ru(M, tm)
    xpp = jnp.pad(xp, ((0, 0), (0, Mp - M), (0, 0)))
    s, sq = pl.pallas_call(
        _bn_stats_kernel,
        grid=(G, Mp // tm),
        in_specs=[pl.BlockSpec((1, tm, Cp), lambda g, i: (g, i, 0))],
        out_specs=[
            pl.BlockSpec((1, 1, Cp), lambda g, i: (g, 0, 0)),
            pl.BlockSpec((1, 1, Cp), lambda g, i: (g, 0, 0)),
        ],
        out_shape=[
            jax.ShapeDtypeStruct((G, 1, Cp), jnp.float32),
            jax.ShapeDtypeStruct((G, 1, Cp), jnp.float32),
        ],
        compiler_params=pltpu.CompilerParams(
            dimension_semantics=("parallel", "arbitrary"),
            vmem_limit_bytes=_VMEM_LIMIT),
    )(xpp)
    scale, shift = _bn_scale_shift(s[:, 0, :], sq[:, 0, :], M, gamma, beta, Cp, eps)
    out = pallas_bn_scale(xp, scale, shift, relu=relu)
    return out[:, :, :C]


def bn_over_plane_groups(y, s, sq, groups, gamma, beta, relu, eps=1e-5):
    """BatchNorm2d (per-plane training stats) using the per-image column sums the
    conv kernel already produced -- no extra statistics pass over the activation."""
    B, H, W, Cp = y.shape
    per = B // groups
    m_rows = per * H * W
    s_g = s.reshape(groups, per, Cp).sum(axis=1)
    sq_g = sq.reshape(groups, per, Cp).sum(axis=1)
    scale, shift = _bn_scale_shift(s_g, sq_g, m_rows, gamma, beta, Cp, eps)
    out = pallas_bn_scale(y.reshape(groups, per * H * W, Cp), scale, shift, relu=relu)
    return out.reshape(B, H, W, Cp)


# ---------------------------------------------------------------------------
# Plain-JAX glue (cheap / data-dependent ops)
# ---------------------------------------------------------------------------
def maxpool2x2_nhwc(x):
    b, H, W, C = x.shape
    return x.reshape(b, H // 2, 2, W // 2, 2, C).max(axis=(2, 4))


def normalize_coordinate(p, padding=0.1, plane='xz'):
    if plane == 'xz':
        xy = p[..., jnp.array([0, 2])]
    elif plane == 'xy':
        xy = p[..., jnp.array([0, 1])]
    else:
        xy = p[..., jnp.array([1, 2])]
    xy = xy / (1.0 + padding + 10e-6) + 0.5
    xy = jnp.where(xy >= 1.0, xy - 10e-6, xy)
    xy = jnp.where(xy < 0.0, 0.0, xy)
    return xy


def sample_plane_feature(p, feat_nhwc, plane, padding):
    # TODO(synk): F.grid_sample (bilinear, border, align_corners=True) is a
    # data-dependent gather; kept in plain JAX.
    xy = normalize_coordinate(p, padding, plane)
    b, H, W, _ = feat_nhwc.shape
    gx = 2.0 * xy[..., 0] - 1.0
    gy = 2.0 * xy[..., 1] - 1.0
    fx = jnp.clip((gx + 1.0) * 0.5 * (W - 1), 0.0, W - 1)
    fy = jnp.clip((gy + 1.0) * 0.5 * (H - 1), 0.0, H - 1)
    x0 = jnp.floor(fx)
    y0 = jnp.floor(fy)
    x0i = x0.astype(jnp.int32)
    y0i = y0.astype(jnp.int32)
    x1i = jnp.minimum(x0i + 1, W - 1)
    y1i = jnp.minimum(y0i + 1, H - 1)
    wx = (fx - x0)[..., None]
    wy = (fy - y0)[..., None]
    bidx = jnp.arange(b)[:, None]
    f00 = feat_nhwc[bidx, y0i, x0i]
    f01 = feat_nhwc[bidx, y0i, x1i]
    f10 = feat_nhwc[bidx, y1i, x0i]
    f11 = feat_nhwc[bidx, y1i, x1i]
    return (f00 * (1 - wx) * (1 - wy) + f01 * wx * (1 - wy)
            + f10 * (1 - wx) * wy + f11 * wx * wy)


# ---------------------------------------------------------------------------
# DownConv forward
# ---------------------------------------------------------------------------
def downconv_forward(params, p, x_planes, plane_type, c, pooling=True,
                     share_channels=8, padding=0.1):
    b, n, cin = c.shape
    cout = params['fc_k_w'].shape[1]
    sc_dim = cout // share_channels

    # ---- plane pipeline: all three planes stacked into one batch axis ----
    xs = jnp.stack([jnp.transpose(x_planes[k], (0, 2, 3, 1)) for k in _PLANE_KEYS],
                   axis=0).astype(jnp.float32)               # (3, b, H0, W0, cin)
    xs = xs.reshape(3 * b, *xs.shape[2:])
    if pooling:
        xs = maxpool2x2_nhwc(xs)
    H, W = xs.shape[1], xs.shape[2]
    R = H                                                    # reso_plane

    # conv1: Conv3x3 -> BN -> ReLU -> Conv3x3 -> BN (outer F.relu folded into 2nd BN)
    y, s, sq = pallas_conv3x3(xs, params['conv1_0_w'], params['conv1_0_b'])
    t = bn_over_plane_groups(y, s, sq, 3, params['conv1_0_g'], params['conv1_0_beta'], relu=True)
    y, s, sq = pallas_conv3x3(t, params['conv1_2_w'], params['conv1_2_b'])
    planes_feat = bn_over_plane_groups(y, s, sq, 3, params['conv1_2_g'],
                                       params['conv1_2_beta'], relu=True)   # (3b,H,W,Cp)
    x_down = planes_feat

    # conv_q (1x1) on the stacked planes: one MXU matmul over 3*b*H*W rows.
    wq = params['conv_q_w'][:, :, 0, 0].T
    q_flat = pallas_matmul(planes_feat[..., :cout].reshape(3 * b * H * W, cout),
                           wq, params['conv_q_b'])
    q_all = q_flat.reshape(3, b, H, W, cout)

    # ---- point features ----
    c_flat = c.reshape(b * n, cin).astype(jnp.float32)
    # fc_k and fc_v[0] share the same input -> single merged matmul.
    w_kv = jnp.concatenate([params['fc_k_w'], params['fc_v0_w']], axis=1)
    b_kv = jnp.concatenate([params['fc_k_b'], params['fc_v0_b']])
    kv = pallas_matmul(c_flat, w_kv, b_kv)
    k_feat = kv[:, :cout]
    v_feat = jnp.maximum(kv[:, cout:], 0.0)                  # ReLU of fc_v[0]
    v_feat = pallas_matmul(v_feat, params['fc_v1_w'], params['fc_v1_b'], relu=True)
    v_feat = pallas_matmul(v_feat, params['fc_v2_w'], params['fc_v2_b'])
    k3 = k_feat.reshape(b, n, cout)
    v3 = v_feat.reshape(b, n, cout)

    # ---- generate_plane_features, all three planes at once ----
    p_nor = jnp.stack([normalize_coordinate(p, padding, k) for k in _PLANE_KEYS], 0)  # (3,b,n,2)
    idx2 = (p_nor * R).astype(jnp.int32)
    index = idx2[..., 0] + R * idx2[..., 1]                  # (3, b, n)
    pos_enc = p_nor - jnp.floor(p_nor * R) / R

    # fc_pos[0:3]: Linear(2,2)+BatchNorm1d(2)+ReLU in plain JAX (a 2x2 matmul padded
    # to the 128-lane MXU is pure overhead); per-plane batch statistics as in PyTorch.
    t0 = pos_enc.reshape(3, b * n, 2) @ params['fc_pos0_w'] + params['fc_pos0_b']
    mu = jnp.mean(t0, axis=1, keepdims=True)
    var = jnp.maximum(jnp.mean(t0 * t0, axis=1, keepdims=True) - mu * mu, 0.0)
    t0 = (t0 - mu) * jax.lax.rsqrt(var + 1e-5) * params['fc_pos_bn_g'] + params['fc_pos_bn_beta']
    t0 = jnp.maximum(t0, 0.0)
    pos_feat = pallas_matmul(t0.reshape(3 * b * n, 2),
                             params['fc_pos1_w'], params['fc_pos1_b'])
    pos_feat = pos_feat.reshape(3, b, n, cout)

    # gather q at each point's grid cell.
    iy, ix = index // R, index % R
    pidx = jnp.arange(3)[:, None, None]
    bidx = jnp.arange(b)[None, :, None]
    q_g = q_all[pidx, bidx, iy, ix]                          # (3, b, n, cout)

    wfeat = k3[None] - q_g + pos_feat
    wlin = pallas_matmul(wfeat.reshape(3 * b * n, cout), params['fc_w_w'], params['fc_w_b'])
    w_bn = pallas_batchnorm_grouped(wlin.reshape(3, b * n, sc_dim),
                                    params['fc_w_bn_g'], params['fc_w_bn_beta'], relu=True)
    wflat = w_bn.reshape(3 * b * n, sc_dim)

    # TODO(synk): torch_scatter.scatter_softmax / scatter_add are data-dependent
    # scatters; implemented with JAX scatter (segment-style) ops, O(points) memory
    # instead of the dense O(points * R^2) one-hot.
    seg = (jnp.arange(3 * b, dtype=jnp.int32)[:, None] * (R * R)
           + index.reshape(3 * b, n)).reshape(-1)            # (3*b*n,)
    nseg = 3 * b * R * R
    gmax = jnp.full((nseg, sc_dim), -jnp.inf, jnp.float32).at[seg].max(wflat)
    e = jnp.exp(wflat - gmax[seg])
    gsum = jnp.zeros((nseg, sc_dim), jnp.float32).at[seg].add(e)
    weights_soft = e / gsum[seg]

    value = (v3[None] + pos_feat).reshape(3 * b * n, cout)
    value_grid = (value.reshape(3 * b * n, share_channels, sc_dim)
                  * weights_soft[:, None, :]).reshape(3 * b * n, cout)
    fea = jnp.zeros((nseg, cout), jnp.float32).at[seg].add(value_grid)
    fea = fea.reshape(3 * b, R, R, cout)

    # weight_conv on the generated planes + "conv1x1" (a 3x3 conv) residual from the
    # conv1 features -- one stacked Pallas conv each, covering all planes and batches.
    fea_c, _, _ = pallas_conv3x3(fea, params['weight_conv_w'], params['weight_conv_b'], relu=True)
    down_c, _, _ = pallas_conv3x3(x_down, params['conv1x1_w'], params['conv1x1_b'])
    out_all = (fea_c + down_c)[..., :cout].reshape(3, b, R, R, cout)
    conv1_out = planes_feat[..., :cout].reshape(3, b, H, W, cout)

    # ---- outputs ----
    out_planes = {}
    c_out = v3
    for gi, key in enumerate(_PLANE_KEYS):
        if key in plane_type:
            out_planes[key] = out_all[gi]
            c_out = c_out + sample_plane_feature(p, out_all[gi], key, padding)
        else:
            out_planes[key] = conv1_out[gi]

    x_out = {k: jnp.transpose(v, (0, 3, 1, 2)) for k, v in out_planes.items()}  # NCHW
    before_pool = dict(x_out)
    return x_out, before_pool, c_out


# ---------------------------------------------------------------------------
# Deterministic parameter init (shapes from DownConv.__init__; synthetic values)
# Linear weights are stored as (in, out) == PyTorch weight.T.
# ---------------------------------------------------------------------------
def init_params(key, cin, cout, share_channels=8):
    sc = cout // share_channels
    keys = jax.random.split(key, 24)

    def w(i, shape, scale=0.1):
        return jax.random.normal(keys[i], shape, jnp.float32) * scale

    return {
        'conv1_0_w': w(0, (cout, cin, 3, 3)), 'conv1_0_b': w(1, (cout,)),
        'conv1_0_g': jnp.ones((cout,), jnp.float32), 'conv1_0_beta': jnp.zeros((cout,), jnp.float32),
        'conv1_2_w': w(2, (cout, cout, 3, 3)), 'conv1_2_b': w(3, (cout,)),
        'conv1_2_g': jnp.ones((cout,), jnp.float32), 'conv1_2_beta': jnp.zeros((cout,), jnp.float32),
        'fc_k_w': w(4, (cin, cout)), 'fc_k_b': w(5, (cout,)),
        'fc_v0_w': w(6, (cin, cout)), 'fc_v0_b': w(7, (cout,)),
        'fc_v1_w': w(8, (cout, 2 * cout)), 'fc_v1_b': w(9, (2 * cout,)),
        'fc_v2_w': w(10, (2 * cout, cout)), 'fc_v2_b': w(11, (cout,)),
        'conv_q_w': w(12, (cout, cout, 1, 1)), 'conv_q_b': w(13, (cout,)),
        'fc_pos0_w': w(14, (2, 2)), 'fc_pos0_b': w(15, (2,)),
        'fc_pos_bn_g': jnp.ones((2,), jnp.float32), 'fc_pos_bn_beta': jnp.zeros((2,), jnp.float32),
        'fc_pos1_w': w(16, (2, cout)), 'fc_pos1_b': w(17, (cout,)),
        'fc_w_w': w(18, (cout, sc)), 'fc_w_b': w(19, (sc,)),
        'fc_w_bn_g': jnp.ones((sc,), jnp.float32), 'fc_w_bn_beta': jnp.zeros((sc,), jnp.float32),
        'weight_conv_w': w(20, (cout, cout, 3, 3)), 'weight_conv_b': w(21, (cout,)),
        'conv1x1_w': w(22, (cout, cout, 3, 3)), 'conv1x1_b': w(23, (cout,)),
    }


if __name__ == "__main__":
    IN_CH, OUT_CH, RESO = 4, 16, 16
    B, N = 2, 8

    key = jax.random.PRNGKey(0)
    k_p, k_c, k_xy, k_xz, k_yz, k_params = jax.random.split(key, 6)

    p = jax.random.uniform(k_p, (B, N, 3), jnp.float32, minval=-0.5, maxval=0.5)
    c = jax.random.normal(k_c, (B, N, IN_CH), jnp.float32)
    x = {
        'xy': jax.random.normal(k_xy, (B, IN_CH, RESO, RESO), jnp.float32),
        'xz': jax.random.normal(k_xz, (B, IN_CH, RESO, RESO), jnp.float32),
        'yz': jax.random.normal(k_yz, (B, IN_CH, RESO, RESO), jnp.float32),
    }
    params = init_params(k_params, IN_CH, OUT_CH)
    plane_type = ('xy', 'xz', 'yz')

    x_out, before_pool, c_out = downconv_forward(params, p, x, plane_type, c, pooling=True)

    for v in x_out.values():
        jax.block_until_ready(v)
    jax.block_until_ready(c_out)

    assert x_out['xy'].shape == (B, OUT_CH, RESO // 2, RESO // 2)
    assert c_out.shape == (B, N, OUT_CH)
    print("KERNEL_OK")
</pallas_src>

<mosaic_0001>
module attributes {stable_mosaic.version = 11 : i64} {
  func.func @_conv3x3_kernel(%arg0: i32, %arg1: memref<1x80x128xf32, #tpu.memory_space<vmem>>, %arg2: memref<3x128x128xbf16, #tpu.memory_space<vmem>>, %arg3: memref<1x128xf32, #tpu.memory_space<vmem>>, %arg4: memref<1x64x128xf32, #tpu.memory_space<vmem>>, %arg5: memref<1x1x128xf32, #tpu.memory_space<vmem>>, %arg6: memref<1x1x128xf32, #tpu.memory_space<vmem>>) attributes {dimension_semantics = [#tpu.dimension_semantics<parallel>], iteration_bounds = array<i64: 6>, scalar_prefetch = 0 : i64, scratch_operands = 0 : i64, tpu.core_type = #tpu.core_type<tc>, window_params = [{transform_indices = @transform_0, window_bounds = array<i64: 1, 80, 128>}, {pipeline_mode = #tpu.pipeline_mode<synchronous>, transform_indices = @transform_1, window_bounds = array<i64: 3, 128, 128>}, {pipeline_mode = #tpu.pipeline_mode<synchronous>, transform_indices = @transform_2, window_bounds = array<i64: 1, 128>}, {transform_indices = @transform_3, window_bounds = array<i64: 1, 64, 128>}, {transform_indices = @transform_4, window_bounds = array<i64: 1, 1, 128>}, {transform_indices = @transform_5, window_bounds = array<i64: 1, 1, 128>}]} {
    %c0 = arith.constant 0 : index
    %c0_0 = arith.constant 0 : index
    %c0_1 = arith.constant 0 : index
    %0 = vector.load %arg1[%c0, %c0_0, %c0_1] : memref<1x80x128xf32, #tpu.memory_space<vmem>>, vector<1x80x128xf32>
    %1 = vector.shape_cast %0 : vector<1x80x128xf32> to vector<80x128xf32>
    %cst = arith.constant 0.000000e+00 : f32
    %2 = vector.broadcast %cst : f32 to vector<64x128xf32>
    %3 = vector.extract_strided_slice %1 {offsets = [0, 0], sizes = [64, 128], strides = [1, 1]} : vector<80x128xf32> to vector<64x128xf32>
    %4 = arith.truncf %3 : vector<64x128xf32> to vector<64x128xbf16>
    %c0_2 = arith.constant 0 : index
    %c0_3 = arith.constant 0 : index
    %c0_4 = arith.constant 0 : index
    %5 = vector.load %arg2[%c0_2, %c0_3, %c0_4] : memref<3x128x128xbf16, #tpu.memory_space<vmem>>, vector<1x128x128xbf16>
    %6 = vector.shape_cast %5 : vector<1x128x128xbf16> to vector<128x128xbf16>
    %cst_5 = arith.constant dense<0.000000e+00> : vector<64x128xf32>
    %7 = tpu.matmul %4, %6, %cst_5 {dimension_numbers = #tpu.dot_dimension_numbers<[1], [0], [0], [1], [0, 0, 1, 1], [], []>} : vector<64x128xbf16>, vector<128x128xbf16>, vector<64x128xf32> -> vector<64x128xf32>
    %8 = arith.addf %2, %7 : vector<64x128xf32>
    %9 = vector.extract_strided_slice %1 {offsets = [8, 0], sizes = [64, 128], strides = [1, 1]} : vector<80x128xf32> to vector<64x128xf32>
    %10 = arith.truncf %9 : vector<64x128xf32> to vector<64x128xbf16>
    %c1 = arith.constant 1 : index
    %c0_6 = arith.constant 0 : index
    %c0_7 = arith.constant 0 : index
    %11 = vector.load %arg2[%c1, %c0_6, %c0_7] : memref<3x128x128xbf16, #tpu.memory_space<vmem>>, vector<1x128x128xbf16>
    %12 = vector.shape_cast %11 : vector<1x128x128xbf16> to vector<128x128xbf16>
    %cst_8 = arith.constant dense<0.000000e+00> : vector<64x128xf32>
    %13 = tpu.matmul %10, %12, %cst_8 {dimension_numbers = #tpu.dot_dimension_numbers<[1], [0], [0], [1], [0, 0, 1, 1], [], []>} : vector<64x128xbf16>, vector<128x128xbf16>, vector<64x128xf32> -> vector<64x128xf32>
    %14 = arith.addf %8, %13 : vector<64x128xf32>
    %15 = vector.extract_strided_slice %1 {offsets = [16, 0], sizes = [64, 128], strides = [1, 1]} : vector<80x128xf32> to vector<64x128xf32>
    %16 = arith.truncf %15 : vector<64x128xf32> to vector<64x128xbf16>
    %c2 = arith.constant 2 : index
    %c0_9 = arith.constant 0 : index
    %c0_10 = arith.constant 0 : index
    %17 = vector.load %arg2[%c2, %c0_9, %c0_10] : memref<3x128x128xbf16, #tpu.memory_space<vmem>>, vector<1x128x128xbf16>
    %18 = vector.shape_cast %17 : vector<1x128x128xbf16> to vector<128x128xbf16>
    %cst_11 = arith.constant dense<0.000000e+00> : vector<64x128xf32>
    %19 = tpu.matmul %16, %18, %cst_11 {dimension_numbers = #tpu.dot_dimension_numbers<[1], [0], [0], [1], [0, 0, 1, 1], [], []>} : vector<64x128xbf16>, vector<128x128xbf16>, vector<64x128xf32> -> vector<64x128xf32>
    %20 = arith.addf %14, %19 : vector<64x128xf32>
    %c0_12 = arith.constant 0 : index
    %c0_13 = arith.constant 0 : index
    %21 = vector.load %arg3[%c0_12, %c0_13] : memref<1x128xf32, #tpu.memory_space<vmem>>, vector<1x128xf32>
    %22 = vector.broadcast %21 : vector<1x128xf32> to vector<64x128xf32>
    %23 = arith.addf %20, %22 : vector<64x128xf32>
    %c0_14 = arith.constant 0 : index
    %c0_15 = arith.constant 0 : index
    %c0_16 = arith.constant 0 : index
    %24 = vector.load %arg4[%c0_14, %c0_15, %c0_16] : memref<1x64x128xf32, #tpu.memory_space<vmem>>, vector<1x64x128xf32>
    %25 = vector.shape_cast %24 : vector<1x64x128xf32> to vector<64x128xf32>
    %26 = vector.shape_cast %23 : vector<64x128xf32> to vector<1x64x128xf32>
    tpu.vector_store %arg4[%c0_14, %c0_15, %c0_16], %26 {strides = array<i32>} : memref<1x64x128xf32, #tpu.memory_space<vmem>>, vector<1x64x128xf32>,
    %cst_17 = arith.constant dense<0.000000e+00> : vector<128xf32>
    %27 = vector.multi_reduction <add>, %23, %cst_17 [0] : vector<64x128xf32> to vector<128xf32>
    %28 = vector.shape_cast %27 : vector<128xf32> to vector<1x128xf32>
    %c0_18 = arith.constant 0 : index
    %c0_19 = arith.constant 0 : index
    %c0_20 = arith.constant 0 : index
    %29 = vector.load %arg5[%c0_18, %c0_19, %c0_20] : memref<1x1x128xf32, #tpu.memory_space<vmem>>, vector<1x1x128xf32>
    %30 = vector.shape_cast %29 : vector<1x1x128xf32> to vector<1x128xf32>
    %31 = vector.shape_cast %28 : vector<1x128xf32> to vector<1x1x128xf32>
    tpu.vector_store %arg5[%c0_18, %c0_19, %c0_20], %31 {strides = array<i32>} : memref<1x1x128xf32, #tpu.memory_space<vmem>>, vector<1x1x128xf32>,
    %32 = arith.mulf %23, %23 : vector<64x128xf32>
    %cst_21 = arith.constant dense<0.000000e+00> : vector<128xf32>
    %33 = vector.multi_reduction <add>, %32, %cst_21 [0] : vector<64x128xf32> to vector<128xf32>
    %34 = vector.shape_cast %33 : vector<128xf32> to vector<1x128xf32>
    %c0_22 = arith.constant 0 : index
    %c0_23 = arith.constant 0 : index
    %c0_24 = arith.constant 0 : index
    %35 = vector.load %arg6[%c0_22, %c0_23, %c0_24] : memref<1x1x128xf32, #tpu.memory_space<vmem>>, vector<1x1x128xf32>
    %36 = vector.shape_cast %35 : vector<1x1x128xf32> to vector<1x128xf32>
    %37 = vector.shape_cast %34 : vector<1x128xf32> to vector<1x1x128xf32>
    tpu.vector_store %arg6[%c0_22, %c0_23, %c0_24], %37 {strides = array<i32>} : memref<1x1x128xf32, #tpu.memory_space<vmem>>, vector<1x1x128xf32>,
    return
  }
  func.func @transform_0(%arg0: i32) -> (i32, i32, i32) {
    %c0_i32 = arith.constant 0 : i32
    %c0_i32_0 = arith.constant 0 : i32
    %c0_i32_1 = arith.constant 0 : i32
    return %arg0, %c0_i32, %c0_i32_0 : i32, i32, i32
  }
  func.func @transform_1(%arg0: i32) -> (i32, i32, i32) {
    %c0_i32 = arith.constant 0 : i32
    %c0_i32_0 = arith.constant 0 : i32
    %c0_i32_1 = arith.constant 0 : i32
    %c0_i32_2 = arith.constant 0 : i32
    return %c0_i32, %c0_i32_0, %c0_i32_1 : i32, i32, i32
  }
  func.func @transform_2(%arg0: i32) -> (i32, i32) {
    %c0_i32 = arith.constant 0 : i32
    %c0_i32_0 = arith.constant 0 : i32
    %c0_i32_1 = arith.constant 0 : i32
    return %c0_i32, %c0_i32_0 : i32, i32
  }
  func.func @transform_3(%arg0: i32) -> (i32, i32, i32) {
    %c0_i32 = arith.constant 0 : i32
    %c0_i32_0 = arith.constant 0 : i32
    %c0_i32_1 = arith.constant 0 : i32
    return %arg0, %c0_i32, %c0_i32_0 : i32, i32, i32
  }
  func.func @transform_4(%arg0: i32) -> (i32, i32, i32) {
    %c0_i32 = arith.constant 0 : i32
    %c0_i32_0 = arith.constant 0 : i32
    %c0_i32_1 = arith.constant 0 : i32
    return %arg0, %c0_i32, %c0_i32_0 : i32, i32, i32
  }
  func.func @transform_5(%arg0: i32) -> (i32, i32, i32) {
    %c0_i32 = arith.constant 0 : i32
    %c0_i32_0 = arith.constant 0 : i32
    %c0_i32_1 = arith.constant 0 : i32
    return %arg0, %c0_i32, %c0_i32_0 : i32, i32, i32
  }
}

</mosaic_0001>

<bundles_post_ra>
// kernel: tpu_custom_call.1
= control target key start
LH: loop header
LB: loop body
LE: loop exit
PB: predicated region body
PF: predicated region fallthrough
CT: control target
= control target key end

     0   :  { %11 = vsyncpa [#allocation3], 0  ;;  %s1687_s0 = inlined_call_operand.hbm [shape: f32[6,80,128], index: 0, kind: input, shape index: {}]   ;;  %s1688_s1 = inlined_call_operand.hbm [shape: bf16[3,128,128], index: 1, kind: input, shape index: {}]   ;;  %s1689_s2 = inlined_call_operand.vmem [shape: f32[1,128], index: 2, kind: input, shape index: {}]   ;;  %s1690_s3 = inlined_call_operand.hbm [shape: f32[6,64,128], index: 3, kind: output, shape index: {0}]   ;;  %s1691_s4 = inlined_call_operand.hbm [shape: f32[6,1,128], index: 4, kind: output, shape index: {1}]   ;;  %s1692_s5 = inlined_call_operand.hbm [shape: f32[6,1,128], index: 5, kind: output, shape index: {2}]  }
   0x1   :  { %13 = vsyncpa [#allocation3 + $0x1], 0 }
   0x2   :  { %14 = vsyncpa [#allocation6], 0 }
   0x3   :  { %15 = vsyncpa [#allocation4], 0 }
   0x4   :  { %17 = vsyncpa [#allocation4 + $0x1], 0 }
   0x5   :  { %18 = vsyncpa [#allocation9], 0 }
   0x6   :  { %20 = vsyncpa [#allocation9 + $0x1], 0  ;;  %s1420_s18 = smov 0   ;;  %s1422_s19 = smov 0  }
   0x7   :  { %s1424_s20 = smov 0   ;;  %s1426_s21 = smov 0  }
   0x8 LB: > { %s1441_s22 = sadd.s32 4294967295, %s1377_s21   ;;  %s934_s23 = sadd.s32 4294967294, %s1377_s21   ;;  %s1377_s21 = sphi %s1426_s21, %s1713_s21   ;;  %s1373_s20 = sphi %s1424_s20, %s1712_s20   ;;  %s1369_s19 = sphi %s1422_s19, %s1711_s19   ;;  %s1365_s18 = sphi %s1420_s18, %s1710_s18  }
   0x9   : > { %p46_p0 = scmp.ne.s32.totalorder %s1369_s19, %s1365_s18  ;;  %p1693_p1 = scmp.eq.s32.totalorder %s1441_s22, 0 }
   0xa   : > { %p118_p3 = scmp.eq.s32.totalorder %s934_s23, 5  ;;  %p935_p5 = scmp.ge.s32.totalorder %s1377_s21, 1 }
   0xb   : > { %p1452_p4 = por %p1693_p1, %p46_p0  ;;  %p177_p7 = scmp.lt.s32.totalorder %s1377_s21, 7 }
   0xc   : > { %p1457_p6 = por %p118_p3, %p46_p0  ;;  %s1379_s27 = smov [#allocation5]  }
   0xd   : > { %s1697_s24 = scalar_select %p1452_p4, 1, 0 }
   0xe   : > { %s1698_s25 = scalar_select %p1457_p6, 1, 0 }
   0xf   : > { %p1462_p8 = pnand %p935_p5, %p177_p7  ;;  %s189_s28 = sshll.u32 %s1379_s27, 4  ;;  %s190_s28 = int_to_ptr.vmem [resolvable:$true] %s189_s28 }
  0x10   : > { %s1475_s30 = sadd.s32 1, %s1377_s21   ;;  %s33_s6 = sadd.s32 1, %s1373_s20 }
  0x11   : > { %s1699_s26 = scalar_select %p1462_p8, 1, 0 }
  0x12   : > { %p1114_p9 = pneg %p1462_p8  ;;  %s30_s7 = ssub.s32 %s1377_s21, %s1475_s30 }
  0x13   : > { %s1210_s8 = scalar_lea.vmem %s190_s28, 3072  ;;  %p1218_p3 = scmp.lt.s32.totalorder %s190_s28, %s190_s28 }
  0x14   : > { %p1470_p10 = pnand %p1114_p9, %p1693_p1  ;;  %p1211_p12 = scmp.ne.s32.totalorder %s190_s28, %s1210_s8 }
  0x15   : > { %p1219_p5 = scmp.lt.s32.totalorder %s1210_s8, %s1210_s8 }
  0x16   : > { %p1201_p11 = pneg %p1470_p10 }
  0x17   : > { %p1220_p7 = por %p1219_p5, %p1218_p3 }
  0x18   : > { %p1213_p13 = pnand %p1211_p12, %p1201_p11 }
  0x1a   : > { %p1214_p0 = pneg %p1213_p13 }
  0x1c   : > { %p1221_p2 = pnand %p1220_p7, %p1214_p0 }
  0x1e   : > { %1224 = shalt.err (!%p1221_p2)
}
  0x1f   : > { %s1380_s9 = smov 64   ;;  %s1381_s10 = smov 4  }
  0x20   : > { %1117 = dma.hbm_to_vmem [thread:$0]  (!%p1470_p10), %s1688_s1, 3072, %s190_s28, [#allocation6], %s1380_s9, %s1380_s9, %s1381_s10  }
  0x21   : > { %p31_p9 = scmp.eq.s32.totalorder %s30_s7, 0  ;;  %p40_p11 = scmp.ne.s32.totalorder %s1373_s20, %s1369_s19 }
  0x22   : > { %p41_p12 = scmp.eq.s32.totalorder %s1377_s21, 0  ;;  %p1133_p2 = scmp.lt.s32.totalorder %s1377_s21, 6 }
  0x23   : > { %s1492_s13 = scalar_select %p31_p9, %s1373_s20, %s33_s6  }
  0x24   : > { %p42_p13 = por %p41_p12, %p40_p11  ;;  %p1701_p0 = scmp.eq.s32.totalorder %s1441_s22, 5 }
  0x25   : > { %s206_s15 = sand.u32 1, %s1373_s20   ;;  %s1100_s16 = smul.u32 1280, %s1377_s21 }
  0x26   : > { %p1496_p3 = por %p1701_p0, %p40_p11  ;;  %s1099_s17 = smul.u32 80, %s206_s15 }
  0x27   : > { %s1505_s8 = scalar_lea.hbm %s1687_s0, %s1100_s16  ;;  %p1507_p10 = pnand %p1133_p2, %p42_p13 }
  0x28   : > { %s1702_s14 = scalar_select %p1496_p3, 1, 0 }
  0x29   : > { %s210_s6 = scalar_lea.vmem [#allocation2], %s1099_s17  ;;  %s1513_s9 = scalar_lea.sflag [#allocation3], %s206_s15 }
  0x2a   : > { %s217_s7 = sshll.u32 %s210_s6, 4  ;;  %s1225_s10 = scalar_lea.hbm %s1505_s8, 1280  ;;  %s1511_s7 = int_to_ptr.vmem [resolvable:$true] %s217_s7 }
  0x2b   : > { %p1226_p5 = scmp.ne.s32.totalorder %s1505_s8, %s1225_s10  ;;  %p1227_p7 = pneg %p1507_p10 }
  0x2c   : > { %s1230_s16 = scalar_lea.hbm %s1687_s0, 7680  ;;  %p1231_p12 = scmp.lt.s32.totalorder %s1505_s8, %s1687_s0 }
  0x2d   : > { %p1228_p9 = pnand %p1227_p7, %p1226_p5  ;;  %p1232_p2 = scmp.lt.s32.totalorder %s1230_s16, %s1225_s10 }
  0x2f   : > { %p1229_p11 = pneg %p1228_p9  ;;  %p1233_p13 = por %p1232_p2, %p1231_p12 }
  0x31   : > { %p1234_p0 = pnand %p1233_p13, %p1229_p11 }
  0x33   : > { %1237 = shalt.err (!%p1234_p0)
}
  0x34   : > { %s1238_s15 = scalar_lea.vmem %s1511_s7, 1280  ;;  %s1382_s17 = smov [#allocation2]  }
  0x35   : > { %p1239_p1 = scmp.ne.s32.totalorder %s1511_s7, %s1238_s15  ;;  %s1243_s6 = sshll.u32 %s1382_s17, 4  ;;  %s1244_s6 = int_to_ptr.vmem [resolvable:$false] %s1243_s6 }
  0x36   : > { %s1245_s11 = scalar_lea.vmem %s1244_s6, 2560  ;;  %p1246_p9 = scmp.lt.s32.totalorder %s1511_s7, %s1244_s6 }
  0x37   : > { %p1241_p6 = pnand %p1239_p1, %p1227_p7  ;;  %p1247_p3 = scmp.lt.s32.totalorder %s1245_s11, %s1238_s15 }
  0x39   : > { %p1242_p5 = pneg %p1241_p6  ;;  %p1248_p4 = por %p1247_p3, %p1246_p9 }
  0x3b   : > { %p1249_p8 = pnand %p1248_p4, %p1242_p5 }
  0x3d   : > { %1252 = shalt.err (!%p1249_p8)
}
  0x3e   : > { %s1383_s10 = smov 128   ;;  %s1384_s12 = smov 8  }
  0x3f   : > { %1121 = dma.hbm_to_vmem [thread:$0]  (!%p1507_p10), %s1505_s8, 1280, %s1511_s7, %s1513_s9, %s1383_s10, %s1383_s10, %s1384_s12  }
  0x40   : > { %p1704_p1 = scmp.ne.s32.totalorder %s1699_s26, 0 }
  0x41   : > { %s1537_s16 = sand.u32 (!%p1704_p1), 1, %s1369_s19   ;;  %p1705_p4 = scmp.ne.s32.totalorder (!%p1704_p1), %s1697_s24, 0 }
  0x42   : > { %229 = sbr.rel (%p1704_p1) target bundleno = 413 (0x19d), region = 32  ;;  %s232_s29 = scalar_lea.sflag (!%p1704_p1), [#allocation3], %s1537_s16 }
  0x43   : > { %s1101_s27 = smul.u32 (!%p1704_p1), 80, %s1537_s16 }
  0x45   : > { %s1541_s15 = scalar_lea.vmem (!%p1704_p1), [#allocation2], %s1101_s27 }
  0x47   : > { %1348 = dma.done.wait (%p1705_p4), %s232_s29, 1280  }
  0x48   : > { %1350 = vsyncadd (%p1705_p4), %s232_s29, 4294966016  ;;  %p1706_p6 = scmp.eq.s32.totalorder %s1441_s22, 0 }
  0x4a   : > { %1352 = dma.done.wait (%p1706_p6), [#allocation6], 3072   ;;  %p1707_p8 = pmov %p1706_p6 }
  0x4b   : > { %v1175_v0 = vld [vmem:[#allocation5 + $0x78] sm:$0xff]   ;;  %v1177_v2 = vld [vmem:[#allocation5 + $0x70] sm:$0xff]   ;;  %v1179_v4 = vld [vmem:[#allocation5 + $0x68] sm:$0xff]   ;;  %s941_s24 = sshll.u32 %s1537_s16, 6  ;;  %s974_s9 = sshll.u32 %s1441_s22, 10 }
  0x4c   : > { %1354 = vsyncadd (%p1707_p8), [#allocation6], 4294964224  ;;  %v1176_v1 = vld [vmem:[#allocation5 + $0x38] sm:$0xff]   ;;  %1011 = vmatprep.subr.bf16.mxu0 %v1175_v0  ;;  %v1178_v3 = vld [vmem:[#allocation5 + $0x30] sm:$0xff]   ;;  %s261_s28 = scalar_lea.vmem [#allocation7], %s941_s24  ;;  %s1574_s11 = scalar_lea.hbm %s1690_s3, %s974_s9 }
  0x4d   : > { %1035 = vmatprep.subr.bf16.mxu1 %v1176_v1  ;;  %1012 = vmatpush3.bf16.msra.mxu0 %v1175_v0  ;;  %v1180_v5 = vld [vmem:[#allocation5 + $0x28] sm:$0xff]   ;;  %v1181_v6 = vld [vmem:[#allocation5 + $0x60] sm:$0xff]   ;;  %v1183_v8 = vld [vmem:[#allocation5 + $0x58] sm:$0xff]   ;;  %s772_s7 = sshll.u32 %s261_s28, 4  ;;  %s751_s10 = scalar_lea.sflag [#allocation4], %s1537_s16  ;;  %s1569_s7 = int_to_ptr.vmem [resolvable:$true] %s772_s7 }
  0x4e   : > { %1036 = vmatpush3.bf16.msra.mxu1 %v1176_v1  ;;  %1013 = vmatprep.subr.bf16.mxu0 %v1177_v2  ;;  %v1182_v7 = vld [vmem:[#allocation5 + $0x20] sm:$0xff]   ;;  %v1184_v9 = vld [vmem:[#allocation5 + $0x18] sm:$0xff]   ;;  %v1185_v10 = vld [vmem:[#allocation5 + $0x50] sm:$0xff]   ;;  %s1253_s12 = scalar_lea.vmem %s1569_s7, 1024  ;;  %p1708_p10 = scmp.ne.s32.totalorder %s1702_s14, 0 }
  0x4f   : > { %1037 = vmatprep.subr.bf16.mxu1 %v1178_v3  ;;  %v276_v11 = vld [vmem:[%s1541_s15 + $0x8] sm:$0xff]  ;;  %v277_v12 = vld [vmem:[%s1541_s15 + $0x10] sm:$0xff]  ;;  %v275_v15 = vld [vmem:[%s1541_s15] sm:$0xff]  ;;  %p1254_p3 = scmp.ne.s32.totalorder %s1569_s7, %s1253_s12  ;;  %s1385_s27 = smov [#allocation7]  }
  0x50   : > { %v1186_v13 = vld [vmem:[#allocation5 + $0x10] sm:$0xff]   ;;  %v305_v14 = vpack.c.bf16 %v277_v12, %v276_v11  ;;  %v285_v16 = vpack.c.bf16 %v276_v11, %v275_v15  ;;  %v1187_v17 = vld [vmem:[#allocation5 + $0x48] sm:$0xff]   ;;  %v1189_v19 = vld [vmem:[#allocation5 + $0x40] sm:$0xff]   ;;  %s1257_s29 = sshll.u32 %s1385_s27, 4  ;;  %s1258_s29 = int_to_ptr.vmem [resolvable:$false] %s1257_s29 }
  0x51   : > { %1014 = vmatpush3.bf16.msra.mxu0 %v1177_v2  ;;  %v1188_v18 = vld [vmem:[#allocation5 + $0x8] sm:$0xff]   ;;  %v1190_v20 = vld [vmem:[#allocation5] sm:$0xff]   ;;  %v1191_v23 = vld [vmem:[#allocation5 + $0xb8] sm:$0xff]   ;;  %p1255_p7 = pnand %p1254_p3, %p1708_p10  ;;  %p1260_p12 = scmp.lt.s32.totalorder %s1569_s7, %s1258_s29 }
  0x52   : > { %1038 = vmatpush3.bf16.msra.mxu1 %v1178_v3  ;;  %1015 = vmatprep.subr.bf16.mxu0 %v1179_v4  ;;  %v278_v21 = vld [vmem:[%s1541_s15 + $0x18] sm:$0xff]  ;;  %v279_v22 = vld [vmem:[%s1541_s15 + $0x20] sm:$0xff]  ;;  %v280_v25 = vld [vmem:[%s1541_s15 + $0x28] sm:$0xff] }
  0x53   : > { %1039 = vmatprep.subr.bf16.mxu1 %v1180_v5  ;;  %1027 = vmatprep.mubr.bf16.mxu0 %v305_v14  ;;  %v306_v24 = vpack.c.bf16 %v279_v22, %v278_v21  ;;  %v281_v26 = vld [vmem:[%s1541_s15 + $0x30] sm:$0xff]  ;;  %v286_v27 = vpack.c.bf16 %v278_v21, %v277_v12  ;;  %v287_v30 = vpack.c.bf16 %v280_v25, %v279_v22  ;;  %v282_v31 = vld [vmem:[%s1541_s15 + $0x38] sm:$0xff]  ;;  %v283_v32 = vld [vmem:[%s1541_s15 + $0x40] sm:$0xff]  ;;  %p1256_p11 = pneg %p1255_p7 }
  0x54   : > { %1051 = vmatprep.mubr.bf16.mxu1 %v285_v16  ;;  %v1192_v28 = vld [vmem:[#allocation5 + $0xb0] sm:$0xff]   ;;  %v307_v29 = vpack.c.bf16 %v281_v26, %v280_v25  ;;  %v1193_v33 = vld [vmem:[#allocation5 + $0xa8] sm:$0xff]   ;;  %v308_v34 = vpack.c.bf16 %v283_v32, %v282_v31  ;;  %v288_v35 = vpack.c.bf16 %v282_v31, %v281_v26  ;;  %v1194_v36 = vld [vmem:[#allocation5 + $0xa0] sm:$0xff]  }
  0x55   : > { %1016 = vmatpush3.bf16.msra.mxu0 %v1179_v4  ;;  %v1195_v37 = vld [vmem:[#allocation5 + $0x98] sm:$0xff]   ;;  %v1196_v38 = vld [vmem:[#allocation5 + $0x90] sm:$0xff]   ;;  %v1197_v39 = vld [vmem:[#allocation5 + $0x88] sm:$0xff]  }
  0x56   : > { %1040 = vmatpush3.bf16.msra.mxu1 %v1180_v5  ;;  %1017 = vmatprep.subr.bf16.mxu0 %v1181_v6  ;;  %v1198_v40 = vld [vmem:[#allocation5 + $0x80] sm:$0xff]   ;;  %v284_v41 = vld [vmem:[%s1541_s15 + $0x48] sm:$0xff]  ;;  %s1259_s15 = scalar_lea.vmem %s1258_s29, 2048 }
  0x57   : > { %1041 = vmatprep.subr.bf16.mxu1 %v1182_v7  ;;  %v552_v42 = vpack.c.bf16 %v284_v41, %v283_v32  ;;  %v966_v62 = vld [vmem:[%s1689_s2] ss:$0 sm:$0xff]  ;;  %p1261_p2 = scmp.lt.s32.totalorder %s1259_s15, %s1253_s12 }
  0x59   : > { %1018 = vmatpush3.bf16.msra.mxu0 %v1181_v6  ;;  %p1262_p13 = por %p1261_p2, %p1260_p12 }
  0x5a   : > { %1042 = vmatpush3.bf16.msra.mxu1 %v1182_v7  ;;  %1019 = vmatprep.subr.bf16.mxu0 %v1183_v8 }
  0x5b   : > { %1043 = vmatprep.subr.bf16.mxu1 %v1184_v9  ;;  %p1263_p0 = pnand %p1262_p13, %p1256_p11 }
  0x5d   : > { %1020 = vmatpush3.bf16.msra.mxu0 %v1183_v8 }
  0x5e   : > { %1044 = vmatpush3.bf16.msra.mxu1 %v1184_v9  ;;  %1021 = vmatprep.subr.bf16.mxu0 %v1185_v10 }
  0x5f   : > { %1045 = vmatprep.subr.bf16.mxu1 %v1186_v13 }
  0x61   : > { %1022 = vmatpush3.bf16.msra.mxu0 %v1185_v10 }
  0x62   : > { %1046 = vmatpush3.bf16.msra.mxu1 %v1186_v13  ;;  %1023 = vmatprep.subr.bf16.mxu0 %v1187_v17 }
  0x63   : > { %1047 = vmatprep.subr.bf16.mxu1 %v1188_v18 }
  0x65   : > { %1024 = vmatpush3.bf16.msra.mxu0 %v1187_v17 }
  0x66   : > { %1048 = vmatpush3.bf16.msra.mxu1 %v1188_v18  ;;  %1025 = vmatprep.subr.bf16.mxu0 %v1189_v19 }
  0x67   : > { %1049 = vmatprep.subr.bf16.mxu1 %v1190_v20 }
  0x69   : > { %1026 = vmatpush3.bf16.msra.mxu0 %v1189_v19 }
  0x6a   : > { %1050 = vmatpush3.bf16.msra.mxu1 %v1190_v20  ;;  %1059 = vmatprep.subr.bf16.mxu0 %v1191_v23 }
  0x6b   : > { %1083 = vmatprep.subr.bf16.mxu1 %v1191_v23 }
  0x6c   : > { %1028 = vmatmul.mubr.bf16.vlgmr.msra.gmra.mxu0 %v306_v24 }
  0x6d   : > { %1052 = vmatmul.mubr.bf16.vlgmr.msra.gmra.mxu1 %v286_v27  ;;  %1060 = vmatpush3.bf16.msra.mxu0 %v1191_v23 }
  0x6e   : > { %1091 = vmatpush3.bf16.msra.mxu1 %v1191_v23  ;;  %1061 = vmatprep.subr.bf16.mxu0 %v1192_v28 }
  0x6f   : > { %1084 = vmatprep.subr.bf16.mxu1 %v1192_v28  ;;  %1031 = vmatprep.mubr.bf16.mxu0 %v307_v29 }
  0x70   : > { %1055 = vmatprep.mubr.bf16.mxu1 %v287_v30 }
  0x71   : > { %1062 = vmatpush3.bf16.msra.mxu0 %v1192_v28 }
  0x72   : > { %1092 = vmatpush3.bf16.msra.mxu1 %v1192_v28  ;;  %1063 = vmatprep.subr.bf16.mxu0 %v1193_v33 }
  0x73   : > { %1085 = vmatprep.subr.bf16.mxu1 %v1193_v33 }
  0x74   : > { %1032 = vmatmul.mubr.bf16.gmra.mxu0 %v308_v34 }
  0x75   : > { %1064 = vmatpush3.bf16.msra.mxu0 %v1193_v33  ;;  %1056 = vmatmul.mubr.bf16.gmra.mxu1 %v288_v35 }
  0x76   : > { %1093 = vmatpush3.bf16.msra.mxu1 %v1193_v33  ;;  %1065 = vmatprep.subr.bf16.mxu0 %v1194_v36 }
  0x77   : > { %1086 = vmatprep.subr.bf16.mxu1 %v1194_v36  ;;  %1075 = vmatprep.mubr.bf16.mxu0 %v286_v27 }
  0x78   : > { %1079 = vmatprep.mubr.bf16.mxu1 %v288_v35 }
  0x79   : > { %1066 = vmatpush3.bf16.msra.mxu0 %v1194_v36 }
  0x7a   : > { %1094 = vmatpush3.bf16.msra.mxu1 %v1194_v36  ;;  %1067 = vmatprep.subr.bf16.mxu0 %v1195_v37 }
  0x7b   : > { %1087 = vmatprep.subr.bf16.mxu1 %v1195_v37 }
  0x7d   : > { %1068 = vmatpush3.bf16.msra.mxu0 %v1195_v37 }
  0x7e   : > { %1095 = vmatpush3.bf16.msra.mxu1 %v1195_v37  ;;  %1069 = vmatprep.subr.bf16.mxu0 %v1196_v38 }
  0x7f   : > { %1088 = vmatprep.subr.bf16.mxu1 %v1196_v38 }
  0x81   : > { %1070 = vmatpush3.bf16.msra.mxu0 %v1196_v38 }
  0x82   : > { %1096 = vmatpush3.bf16.msra.mxu1 %v1196_v38  ;;  %1071 = vmatprep.subr.bf16.mxu0 %v1197_v39 }
  0x83   : > { %1089 = vmatprep.subr.bf16.mxu1 %v1197_v39 }
  0x85   : > { %1072 = vmatpush3.bf16.msra.mxu0 %v1197_v39 }
  0x86   : > { %1097 = vmatpush3.bf16.msra.mxu1 %v1197_v39  ;;  %1073 = vmatprep.subr.bf16.mxu0 %v1198_v40 }
  0x87   : > { %1090 = vmatprep.subr.bf16.mxu1 %v1198_v40 }
  0x89   : > { %1074 = vmatpush3.bf16.msra.mxu0 %v1198_v40 }
  0x8a   : > { %1098 = vmatpush3.bf16.msra.mxu1 %v1198_v40 }
  0x8c   : > { %1076 = vmatmul.mubr.bf16.vlgmr.msra.gmra.mxu0 %v287_v30 }
  0x8d   : > { %1080 = vmatmul.mubr.bf16.vlgmr.msra.gmra.mxu1 %v552_v42 }
 0x12c   : > { %v1029_v43 = vpop.f32.mrf.mxu0 }
 0x12d   : > { %v1053_v44 = vpop.f32.mrf.mxu1 }
 0x12e   : > { %v408_v45 = vpop.f32.mrf.mxu0  ;;  %v530_v58 = vadd.f32 %v1053_v44, %v1029_v43 }
 0x12f   : > { %v521_v46 = vpop.f32.mrf.mxu1 }
 0x130   : > { %v1030_v47 = vpop.f32.mrf.mxu0  ;;  %v522_v63 = vadd.f32 %v521_v46, %v408_v45 }
 0x131   : > { %v1054_v48 = vpop.f32.mrf.mxu1 }
 0x132   : > { %v411_v49 = vpop.f32.mrf.mxu0  ;;  %v533_v5 = vadd.f32 %v1054_v48, %v1030_v47 }
 0x133   : > { %v524_v50 = vpop.f32.mrf.mxu1 }
 0x134   : > { %v1033_v51 = vpop.f32.mrf.mxu0  ;;  %v525_v13 = vadd.f32 %v524_v50, %v411_v49 }
 0x135   : > { %v1057_v52 = vpop.f32.mrf.mxu1 }
 0x136   : > { %v424_v53 = vpop.f32.mrf.mxu0  ;;  %v546_v60 = vadd.f32 %v1057_v52, %v1033_v51 }
 0x137   : > { %v537_v54 = vpop.f32.mrf.mxu1 }
 0x138   : > { %v1034_v55 = vpop.f32.mrf.mxu0  ;;  %v538_v2 = vadd.f32 %v537_v54, %v424_v53 }
 0x139   : > { %v1058_v56 = vpop.f32.mrf.mxu1 }
 0x13a   : > { %v427_v57 = vpop.f32.mrf.mxu0  ;;  %v549_v9 = vadd.f32 %v1058_v56, %v1034_v55 }
 0x13b   : > { %v540_v59 = vpop.f32.mrf.mxu1 }
 0x13c   : > { %v541_v17 = vadd.f32 %v540_v59, %v427_v57 }
 0x14c   : > { %v1077_v61 = vpop.f32.mrf.mxu0 }
 0x14d   : > { %v685_v0 = vadd.f32 %v1077_v61, %v530_v58  ;;  %v1081_v1 = vpop.f32.mrf.mxu1 }
 0x14e   : > { %v689_v3 = vadd.f32 %v1081_v1, %v546_v60  ;;  %v652_v4 = vpop.f32.mrf.mxu0 }
 0x14f   : > { %v700_v6 = vadd.f32 %v966_v62, %v685_v0  ;;  %v683_v7 = vadd.f32 %v652_v4, %v522_v63  ;;  %v668_v8 = vpop.f32.mrf.mxu1 }
 0x150   : > { %v1565_v10 = vadd.f32 %v966_v62, %v689_v3  ;;  %v687_v11 = vadd.f32 %v668_v8, %v538_v2  ;;  %v1078_v12 = vpop.f32.mrf.mxu0 }
 0x151   : > { %708 = vst [vmem:[%s261_s28 + $0x10] sm:$0xff] %v700_v6  ;;  %v698_v14 = vadd.f32 %v966_v62, %v683_v7  ;;  %v686_v15 = vadd.f32 %v1078_v12, %v533_v5  ;;  %v1082_v16 = vpop.f32.mrf.mxu1  ;;  %v730_v31 = vmul.f32 %v700_v6, %v700_v6 }
 0x152   : > { %712 = vst [vmem:[%s261_s28 + $0x30] sm:$0xff] %v1565_v10  ;;  %v702_v18 = vadd.f32 %v966_v62, %v687_v11  ;;  %v690_v19 = vadd.f32 %v1082_v16, %v549_v9  ;;  %v655_v20 = vpop.f32.mrf.mxu0 }
 0x153   : > { %706 = vst [vmem:[%s261_s28] sm:$0xff] %v698_v14  ;;  %v701_v21 = vadd.f32 %v966_v62, %v686_v15  ;;  %v684_v22 = vadd.f32 %v655_v20, %v525_v13  ;;  %v671_v23 = vpop.f32.mrf.mxu1  ;;  %v728_v28 = vmul.f32 %v698_v14, %v698_v14 }
 0x154   : > { %710 = vst [vmem:[%s261_s28 + $0x20] sm:$0xff] %v702_v18  ;;  %v705_v24 = vadd.f32 %v966_v62, %v690_v19  ;;  %v688_v25 = vadd.f32 %v671_v23, %v541_v17 }
 0x155   : > { %709 = vst [vmem:[%s261_s28 + $0x18] sm:$0xff] %v701_v21  ;;  %v699_v26 = vadd.f32 %v966_v62, %v684_v22 }
 0x156   : > { %713 = vst [vmem:[%s261_s28 + $0x38] sm:$0xff] %v705_v24  ;;  %v703_v27 = vadd.f32 %v966_v62, %v688_v25 }
 0x157   : > { %707 = vst [vmem:[%s261_s28 + $0x8] sm:$0xff] %v699_v26  ;;  %v714_v29 = vadd.f32 %v699_v26, %v698_v14  ;;  %v729_v30 = vmul.f32 %v699_v26, %v699_v26 }
 0x158   : > { %711 = vst [vmem:[%s261_s28 + $0x28] sm:$0xff] %v703_v27 }
 0x159   : > { %v715_v32 = vadd.f32 %v714_v29, %v700_v6  ;;  %v736_v33 = vadd.f32 %v729_v30, %v728_v28 }
 0x15a   : > { %1266 = shalt.err (!%p1263_p0)
}
 0x15b   : > { %s1267_s24 = scalar_lea.hbm %s1574_s11, 1024  ;;  %s1271_s28 = scalar_lea.hbm %s1690_s3, 6144 }
 0x15c   : > { %p1268_p5 = scmp.ne.s32.totalorder %s1574_s11, %s1267_s24  ;;  %p1272_p4 = scmp.lt.s32.totalorder %s1574_s11, %s1690_s3 }
 0x15d   : > { %p1273_p6 = scmp.lt.s32.totalorder %s1271_s28, %s1267_s24 }
 0x15e   : > { %p1269_p9 = pnand %p1268_p5, %p1708_p10 }
 0x15f   : > { %p1274_p8 = por %p1273_p6, %p1272_p4 }
 0x160   : > { %p1270_p1 = pneg %p1269_p9 }
 0x162   : > { %p1275_p3 = pnand %p1274_p8, %p1270_p1 }
 0x164   : > { %1278 = shalt.err (!%p1275_p3)
}
 0x165   : > { %s1386_s6 = smov 128   ;;  %s1387_s12 = smov 8   ;;  %v731_v34 = vmul.f32 %v701_v21, %v701_v21  ;;  %v737_v35 = vadd.f32 %v736_v33, %v730_v31  ;;  %v716_v36 = vadd.f32 %v715_v32, %v701_v21  ;;  %v732_v37 = vmul.f32 %v702_v18, %v702_v18 }
 0x166   : > { %1108 = dma.vmem_to_hbm [thread:$0]  (%p1708_p10), %s1569_s7, 1024, %s1574_s11, %s751_s10, %s1386_s6, %s1386_s6, %s1387_s12   ;;  %v733_v41 = vmul.f32 %v703_v27, %v703_v27  ;;  %v734_v43 = vmul.f32 %v1565_v10, %v1565_v10  ;;  %v735_v46 = vmul.f32 %v705_v24, %v705_v24 }
 0x167   : > { %v717_v38 = vadd.f32 %v716_v36, %v702_v18  ;;  %v738_v39 = vadd.f32 %v737_v35, %v731_v34  ;;  %s755_s7 = sand.u32 1, %s1441_s22   ;;  %s970_s11 = sshll.u32 %s1441_s22, 4 }
 0x168   : > { %s267_s10 = scalar_lea.vmem [#allocation8], %s1537_s16  ;;  %s273_s29 = scalar_lea.vmem [#allocation10], %s1537_s16 }
 0x169   : > { %v718_v40 = vadd.f32 %v717_v38, %v703_v27  ;;  %v739_v42 = vadd.f32 %v738_v39, %v732_v37  ;;  %s788_s27 = sshll.u32 %s267_s10, 4  ;;  %s801_s15 = sshll.u32 %s273_s29, 4  ;;  %s1613_s27 = int_to_ptr.vmem [resolvable:$true] %s788_s27  ;;  %s1620_s15 = int_to_ptr.vmem [resolvable:$true] %s801_s15 }
 0x16a   : > { %s1611_s8 = scalar_lea.hbm %s1691_s4, %s970_s11  ;;  %s1618_s9 = scalar_lea.hbm %s1692_s5, %s970_s11 }
 0x16b   : > { %v719_v44 = vadd.f32 %v718_v40, %v1565_v10  ;;  %v740_v45 = vadd.f32 %v739_v42, %v733_v41  ;;  %s1622_s17 = scalar_lea.sflag [#allocation9], %s755_s7  ;;  %s1279_s6 = scalar_lea.vmem %s1613_s27, 16 }
 0x16c   : > { %p1280_p7 = scmp.ne.s32.totalorder %s1613_s27, %s1279_s6  ;;  %s1388_s12 = smov [#allocation8]  }
 0x16d   : > { %v720_v47 = vadd.f32 %v719_v44, %v705_v24  ;;  %v741_v48 = vadd.f32 %v740_v45, %v734_v43  ;;  %s1283_s24 = sshll.u32 %s1388_s12, 4  ;;  %s1284_s24 = int_to_ptr.vmem [resolvable:$false] %s1283_s24 }
 0x16e   : > { %p1281_p11 = pnand %p1280_p7, %p1708_p10  ;;  %s1285_s26 = scalar_lea.vmem %s1284_s24, 32 }
 0x16f   : > { %v721_v49 = vrot.slane %v720_v47, 4  ;;  %v742_v50 = vadd.f32 %v741_v48, %v735_v46  ;;  %p1286_p2 = scmp.lt.s32.totalorder %s1613_s27, %s1284_s24  ;;  %p1287_p13 = scmp.lt.s32.totalorder %s1285_s26, %s1279_s6 }
 0x170   : > { %p1282_p12 = pneg %p1281_p11 }
 0x171   : > { %v722_v51 = vadd.f32 %v721_v49, %v720_v47  ;;  %v743_v52 = vrot.slane %v742_v50, 4  ;;  %p1288_p0 = por %p1287_p13, %p1286_p2 }
 0x173   : > { %v744_v53 = vadd.f32 %v743_v52, %v742_v50  ;;  %v723_v54 = vrot.slane %v722_v51, 2  ;;  %p1289_p5 = pnand %p1288_p0, %p1282_p12 }
 0x175   : > { %v724_v55 = vadd.f32 %v723_v54, %v722_v51  ;;  %v745_v56 = vrot.slane %v744_v53, 2 }
 0x177   : > { %v725_v57 = vrot.slane %v724_v55, 1  ;;  %v746_v58 = vadd.f32 %v745_v56, %v744_v53 }
 0x179   : > { %v726_v59 = vadd.f32 %v725_v57, %v724_v55  ;;  %v747_v60 = vrot.slane %v746_v58, 1 }
 0x17b   : > { %727 = vst [vmem:[%s267_s10] sm:$0x1] %v726_v59  ;;  %v748_v61 = vadd.f32 %v747_v60, %v746_v58 }
 0x17c   : > { %1292 = shalt.err (!%p1289_p5)
}
 0x17d   : > { %s1293_s7 = scalar_lea.hbm %s1611_s8, 16  ;;  %s1297_s22 = scalar_lea.hbm %s1691_s4, 96 }
 0x17e   : > { %p1294_p9 = scmp.ne.s32.totalorder %s1611_s8, %s1293_s7  ;;  %p1298_p6 = scmp.lt.s32.totalorder %s1611_s8, %s1691_s4 }
 0x17f   : > { %p1299_p8 = scmp.lt.s32.totalorder %s1297_s22, %s1293_s7 }
 0x180   : > { %p1295_p1 = pnand %p1294_p9, %p1708_p10 }
 0x181   : > { %p1300_p3 = por %p1299_p8, %p1298_p6 }
 0x182   : > { %p1296_p4 = pneg %p1295_p1 }
 0x184   : > { %p1301_p7 = pnand %p1300_p3, %p1296_p4 }
 0x186   : > { %1304 = shalt.err (!%p1301_p7)
}
 0x187   : > { %1109 = dma.vmem_to_hbm [thread:$0]  (%p1708_p10), %s1613_s27, 16, %s1611_s8, %s1622_s17   ;;  %749 = vst [vmem:[%s273_s29] sm:$0x1] %v748_v61 }
 0x188   : > { %s1305_s6 = scalar_lea.vmem %s1620_s15, 16  ;;  %s1389_s24 = smov [#allocation10]  }
 0x189   : > { %p1306_p11 = scmp.ne.s32.totalorder %s1620_s15, %s1305_s6  ;;  %s1309_s26 = sshll.u32 %s1389_s24, 4  ;;  %s1310_s26 = int_to_ptr.vmem [resolvable:$false] %s1309_s26 }
 0x18a   : > { %s1311_s7 = scalar_lea.vmem %s1310_s26, 32  ;;  %p1312_p13 = scmp.lt.s32.totalorder %s1620_s15, %s1310_s26 }
 0x18b   : > { %p1307_p12 = pnand %p1306_p11, %p1708_p10  ;;  %p1313_p0 = scmp.lt.s32.totalorder %s1311_s7, %s1305_s6 }
 0x18d   : > { %p1308_p2 = pneg %p1307_p12  ;;  %p1314_p5 = por %p1313_p0, %p1312_p13 }
 0x18f   : > { %p1315_p9 = pnand %p1314_p5, %p1308_p2 }
 0x191   : > { %1318 = shalt.err (!%p1315_p9)
}
 0x192   : > { %s1319_s16 = scalar_lea.hbm %s1618_s9, 16  ;;  %s1323_s8 = scalar_lea.hbm %s1692_s5, 96 }
 0x193   : > { %p1320_p1 = scmp.ne.s32.totalorder %s1618_s9, %s1319_s16  ;;  %p1324_p8 = scmp.lt.s32.totalorder %s1618_s9, %s1692_s5 }
 0x194   : > { %p1325_p3 = scmp.lt.s32.totalorder %s1323_s8, %s1319_s16 }
 0x195   : > { %p1321_p4 = pnand %p1320_p1, %p1708_p10 }
 0x196   : > { %p1326_p7 = por %p1325_p3, %p1324_p8 }
 0x197   : > { %p1322_p6 = pneg %p1321_p4 }
 0x199   : > { %p1327_p11 = pnand %p1326_p7, %p1322_p6 }
 0x19b   : > { %1330 = shalt.err (!%p1327_p11)
}
 0x19c   : > { %1110 = dma.vmem_to_hbm [thread:$0]  (%p1708_p10), %s1620_s15, 16, %s1618_s9, %s1622_s17  }
 0x19d PF: > { %p1135_p12 = scmp.ge.s32.totalorder %s1377_s21, 2  ;;  %s813_s22 = sand.u32 1, %s1365_s18  }
 0x19e   : > { %p1709_p2 = scmp.ne.s32.totalorder %s1698_s25, 0  ;;  %s814_s28 = scalar_lea.sflag [#allocation4], %s813_s22 }
 0x1a0   : > { %p1123_p13 = pnand %p1135_p12, %p1709_p2 }
 0x1a2   : > { %p1124_p0 = pneg %p1123_p13 }
 0x1a4   : > { %1356 = dma.done.wait (%p1124_p0), %s814_s28, 1024  }
 0x1a5   : > { %1358 = vsyncadd (%p1124_p0), %s814_s28, 4294966272  ;;  %s822_s12 = sand.u32 1, %s934_s23  }
 0x1a6   : > { %s823_s14 = scalar_lea.sflag [#allocation9], %s822_s12 }
 0x1a7   : > { %1360 = dma.done.wait (%p1124_p0), %s823_s14, 32  }
 0x1a8   : > { %1362 = vsyncadd (%p1124_p0), %s823_s14, 4294967264  ;;  %p23_p10 = scmp.ge.s32.totalorder %s1475_s30, 8   ;;  %s1710_s18 = smov %s1369_s19 }
 0x1a9   : > { %s1711_s19 = smov %s1373_s20  ;;  %s1712_s20 = smov %s1492_s13 }
 0x1aa   : > { %s1713_s21 = smov %s1475_s30  ;;  %25 = sbr.rel (!%p23_p10) target bundleno = 8 (0x8), region = 115 }
 0x1af   :  { %835 = vsyncpa [#allocation3], 1 }
 0x1b0   :  { %837 = vsyncpa [#allocation3 + $0x1], 1 }
 0x1b1   :  { %838 = vsyncpa [#allocation6], 1 }
 0x1b2   :  { %839 = vsyncpa [#allocation4], 1 }
 0x1b3   :  { %841 = vsyncpa [#allocation4 + $0x1], 1 }
 0x1b4   :  { %842 = vsyncpa [#allocation9], 1 }
 0x1b5   :  { %844 = vsyncpa [#allocation9 + $0x1], 1 }

</bundles_post_ra>
